<compile_context>
chip_gen: v7x
topology: tpu7x:2x2x1
jax: 0.10.0
libtpu: 0.0.40
codegen_flags: <defaults>
</compile_context>

<pallas_src>
import math
import functools

import jax
import jax.numpy as jnp
from jax.experimental import pallas as pl
from jax.experimental.pallas import tpu as pltpu


# ----------------------- tiled linear kernel: y = x @ W^T + b -----------------------
def _linear_kernel(x_ref, wt_ref, b_ref, o_ref):
    o_ref[...] = (jnp.dot(x_ref[...], wt_ref[...],
                          preferred_element_type=jnp.float32)
                  + b_ref[...]).astype(o_ref.dtype)


def pallas_linear(x, w, b, *, block_rows=512):
    """x: [N, in], w: [out, in] (PyTorch nn.Linear layout), b: [out] -> [N, out]."""
    n, in_dim = x.shape
    out_dim = w.shape[0]
    tm = min(block_rows, n)                      # row tile; W^T and bias stay resident
    return pl.pallas_call(
        _linear_kernel,
        grid_spec=pltpu.PrefetchScalarGridSpec(
            num_scalar_prefetch=0,
            grid=(pl.cdiv(n, tm),),
            in_specs=[
                pl.BlockSpec((tm, in_dim), lambda i: (i, 0)),
                pl.BlockSpec((in_dim, out_dim), lambda i: (0, 0)),   # resident W^T
                pl.BlockSpec((1, out_dim), lambda i: (0, 0)),        # resident bias
            ],
            out_specs=pl.BlockSpec((tm, out_dim), lambda i: (i, 0)),
        ),
        out_shape=jax.ShapeDtypeStruct((n, out_dim), jnp.float32),
        compiler_params=pltpu.CompilerParams(dimension_semantics=("parallel",)),
    )(x, w.T, b.reshape(1, out_dim))


# --------------------------------- attention kernel ---------------------------------
def _attn_kernel(tlen_ref, q_ref, k_ref, v_ref, rel_ref,
                 u_ref, vp_ref, wr_ref, br_ref, wfft_ref, bff_ref,
                 o_ref, *, num_heads, scale):
    b = pl.program_id(0)
    tl = tlen_ref[b]

    q = q_ref[0]          # [tq, hidden]
    k = k_ref[0]          # [L, hidden]
    v = v_ref[0]          # [L, hidden]
    rel = rel_ref[0]      # [tq, L, hidden]   raw (unprojected) rel_pos_embedding
    u_all = u_ref[...]    # [H, d]
    v_all = vp_ref[...]   # [H, d]
    wr = wr_ref[...]      # [hidden, hidden]  torch layout (rows = output channel)
    br = br_ref[...]      # [1, hidden]
    wfft = wfft_ref[...]  # [hidden, hidden]  W_ff^T (rows = input channel)
    bff = bff_ref[...]    # [1, hidden]

    tq, hidden = q.shape
    L = k.shape[0]
    H = num_heads
    d = hidden // H

    # --- fold W_r / b_r onto the query side (kills the B*L^2 projection) ----------
    # q_r[h] = (q_h + v_h) @ W_r[h*d:(h+1)*d, :]      -> [tq, hidden]
    # bias[h] = (q_h + v_h) . b_r[h*d:(h+1)*d]        -> [tq, 1]
    qr_list, bias_list = [], []
    for h in range(H):
        sl = slice(h * d, (h + 1) * d)
        qv_h = q[:, sl] + v_all[h:h + 1, :]                               # [tq, d]
        qr_list.append(jnp.dot(qv_h, wr[sl, :],
                               preferred_element_type=jnp.float32))       # [tq, hidden]
        bias_list.append(jnp.sum(qv_h * br[:, sl], axis=-1, keepdims=True))
    qr = jnp.stack(qr_list, axis=1)                                        # [tq, H, hidden]

    # Single batched contraction over the lane-dense hidden axis (MXU path):
    #   bd_all[i, h, j] = sum_c qr[i, h, c] * rel[i, j, c]
    bd_all = jnp.einsum('qhc,qjc->qhj', qr, rel,
                        preferred_element_type=jnp.float32)                # [tq, H, L]

    col = jax.lax.broadcasted_iota(jnp.int32, (tq, L), 1)
    key_mask = col < tl

    # ff_final fused epilogue: acc accumulates out_h @ W_ff^T[h-rows] (+ bias once)
    acc = bff + jnp.zeros((tq, hidden), jnp.float32)
    for h in range(H):
        sl = slice(h * d, (h + 1) * d)
        qu_h = q[:, sl] + u_all[h:h + 1, :]
        a_c = jnp.dot(qu_h, k[:, sl].T, preferred_element_type=jnp.float32)   # [tq, L]
        score = (a_c + bd_all[:, h, :] + bias_list[h]) * scale
        score = jnp.where(key_mask, score, jnp.float32(-1e15))
        m = jnp.max(score, axis=-1, keepdims=True)
        e = jnp.exp(score - m)
        s = jnp.sum(e, axis=-1, keepdims=True)
        attn = e * pl.reciprocal(s, approx=True)
        # TODO(synk): attn_dropout=None in the module -> identity (eval mode).
        out_h = jnp.dot(attn, v[:, sl], preferred_element_type=jnp.float32)   # [tq, d]
        acc = acc + jnp.dot(out_h, wfft[sl, :], preferred_element_type=jnp.float32)

    o_ref[0] = acc.astype(o_ref.dtype)     # lane-dense [tq, hidden] store


# -------------------------------------- wrapper --------------------------------------
def multihead_attention_lattice_rel(params, key, query, value, seq_len, lex_num,
                                    rel_pos_embedding, *, num_heads, scaled=True,
                                    q_block=128):
    B, L, hidden = key.shape
    H = num_heads
    d = hidden // H

    # q/k/v projections (tiled Pallas linears).  The rel projection is folded into the
    # attention kernel, so the [B, L, L, hidden] tensor is never projected/transposed.
    k_p = pallas_linear(key.reshape(B * L, hidden),
                        params["w_k"], params["b_k"]).reshape(B, L, hidden)
    q_p = pallas_linear(query.reshape(B * L, hidden),
                        params["w_q"], params["b_q"]).reshape(B, L, hidden)
    v_p = pallas_linear(value.reshape(B * L, hidden),
                        params["w_v"], params["b_v"]).reshape(B, L, hidden)

    total_len = (seq_len + lex_num).astype(jnp.int32)                  # [B]
    scale = (1.0 / math.sqrt(d)) if scaled else 1.0

    tq = min(q_block, L)                # query tiling keeps the rel block VMEM-sized
    grid = (B, pl.cdiv(L, tq))

    grid_spec = pltpu.PrefetchScalarGridSpec(
        num_scalar_prefetch=1,
        grid=grid,
        in_specs=[
            pl.BlockSpec((1, tq, hidden), lambda b, qi, tl: (b, qi, 0)),        # q_p
            pl.BlockSpec((1, L, hidden), lambda b, qi, tl: (b, 0, 0)),          # k_p
            pl.BlockSpec((1, L, hidden), lambda b, qi, tl: (b, 0, 0)),          # v_p
            pl.BlockSpec((1, tq, L, hidden), lambda b, qi, tl: (b, qi, 0, 0)),  # rel raw
            pl.BlockSpec((H, d), lambda b, qi, tl: (0, 0)),                     # u
            pl.BlockSpec((H, d), lambda b, qi, tl: (0, 0)),                     # v param
            pl.BlockSpec((hidden, hidden), lambda b, qi, tl: (0, 0)),           # W_r
            pl.BlockSpec((1, hidden), lambda b, qi, tl: (0, 0)),                # b_r
            pl.BlockSpec((hidden, hidden), lambda b, qi, tl: (0, 0)),           # W_ff^T
            pl.BlockSpec((1, hidden), lambda b, qi, tl: (0, 0)),                # b_ff
        ],
        out_specs=pl.BlockSpec((1, tq, hidden), lambda b, qi, tl: (b, qi, 0)),
    )

    out = pl.pallas_call(
        functools.partial(_attn_kernel, num_heads=H, scale=scale),
        grid_spec=grid_spec,
        out_shape=jax.ShapeDtypeStruct((B, L, hidden), jnp.float32),
        compiler_params=pltpu.CompilerParams(
            dimension_semantics=("parallel", "parallel")),
    )(total_len, q_p, k_p, v_p, rel_pos_embedding,
      params["u"], params["v"], params["w_r"],
      params["b_r"].reshape(1, hidden),
      params["w_ff"].T, params["b_ff"].reshape(1, hidden))
    return out


# ------------------------------ pure-JAX reference -----------------------------------
def reference(params, key, query, value, seq_len, lex_num, rel, *,
              num_heads, scaled=True):
    B, L, hidden = key.shape
    H = num_heads
    d = hidden // H
    lin = lambda x, w, b: x @ w.T + b
    k = lin(key, params["w_k"], params["b_k"]).reshape(B, L, H, d).transpose(0, 2, 1, 3)
    q = lin(query, params["w_q"], params["b_q"]).reshape(B, L, H, d).transpose(0, 2, 1, 3)
    v = lin(value, params["w_v"], params["b_v"]).reshape(B, L, H, d).transpose(0, 2, 1, 3)
    r = lin(rel, params["w_r"], params["b_r"]).reshape(B, L, L, H, d)
    a_c = jnp.einsum('bhid,bhjd->bhij', q + params["u"][None, :, None, :], k)
    b_d = jnp.einsum('bhid,bijhd->bhij', q + params["v"][None, :, None, :], r)
    score = a_c + b_d
    if scaled:
        score = score / math.sqrt(d)
    tl = seq_len + lex_num
    mask = jnp.arange(L)[None, :] < tl[:, None]
    score = jnp.where(mask[:, None, None, :], score, -1e15)
    attn = jax.nn.softmax(score, axis=-1)
    out = jnp.einsum('bhij,bhjd->bhid', attn, v)
    out = out.transpose(0, 2, 1, 3).reshape(B, L, hidden)
    return lin(out, params["w_ff"], params["b_ff"])


# ----------------------------------------- main --------------------------------------
if __name__ == "__main__":
    B, L, hidden, H = 2, 8, 32, 4

    root = jax.random.PRNGKey(0)
    keys = jax.random.split(root, 16)

    def w_init(k, shape, s=0.1):
        return (jax.random.normal(k, shape, dtype=jnp.float32) * s)

    params = {
        "w_k": w_init(keys[0], (hidden, hidden)), "b_k": w_init(keys[1], (hidden,), 0.01),
        "w_q": w_init(keys[2], (hidden, hidden)), "b_q": w_init(keys[3], (hidden,), 0.01),
        "w_v": w_init(keys[4], (hidden, hidden)), "b_v": w_init(keys[5], (hidden,), 0.01),
        "w_r": w_init(keys[6], (hidden, hidden)), "b_r": w_init(keys[7], (hidden,), 0.01),
        "w_ff": w_init(keys[8], (hidden, hidden)), "b_ff": w_init(keys[9], (hidden,), 0.01),
        "u": w_init(keys[10], (H, hidden // H)),
        "v": w_init(keys[11], (H, hidden // H)),
    }

    key_in = jax.random.normal(keys[12], (B, L, hidden), dtype=jnp.float32)
    query_in = jax.random.normal(keys[13], (B, L, hidden), dtype=jnp.float32)
    value_in = jax.random.normal(keys[14], (B, L, hidden), dtype=jnp.float32)
    rel_in = jax.random.normal(keys[15], (B, L, L, hidden), dtype=jnp.float32)
    seq_len = jnp.array([5, 6], dtype=jnp.int32)
    lex_num = jnp.array([3, 1], dtype=jnp.int32)   # max(seq_len + lex_num) == L

    out = multihead_attention_lattice_rel(
        params, key_in, query_in, value_in, seq_len, lex_num, rel_in,
        num_heads=H, scaled=True)
    out = jax.block_until_ready(out)

    ref = reference(params, key_in, query_in, value_in, seq_len, lex_num, rel_in,
                    num_heads=H, scaled=True)
    assert out.shape == (B, L, hidden)
    assert bool(jnp.all(jnp.isfinite(out)))
    assert bool(jnp.allclose(out, ref, rtol=5e-2, atol=5e-2))

    print("KERNEL_OK")
</pallas_src>

<mosaic_0001>
module attributes {stable_mosaic.version = 11 : i64} {
  func.func @_linear_kernel(%arg0: i32, %arg1: memref<16x32xf32, #tpu.memory_space<vmem>>, %arg2: memref<32x32xf32, #tpu.memory_space<vmem>>, %arg3: memref<1x32xf32, #tpu.memory_space<vmem>>, %arg4: memref<16x32xf32, #tpu.memory_space<vmem>>) attributes {dimension_semantics = [#tpu.dimension_semantics<parallel>], iteration_bounds = array<i64: 1>, scalar_prefetch = 0 : i64, scratch_operands = 0 : i64, tpu.core_type = #tpu.core_type<tc>, window_params = [{transform_indices = @transform_0, window_bounds = array<i64: 16, 32>}, {pipeline_mode = #tpu.pipeline_mode<synchronous>, transform_indices = @transform_1, window_bounds = array<i64: 32, 32>}, {pipeline_mode = #tpu.pipeline_mode<synchronous>, transform_indices = @transform_2, window_bounds = array<i64: 1, 32>}, {transform_indices = @transform_3, window_bounds = array<i64: 16, 32>}]} {
    %c0 = arith.constant 0 : index
    %c0_0 = arith.constant 0 : index
    %0 = vector.load %arg1[%c0, %c0_0] : memref<16x32xf32, #tpu.memory_space<vmem>>, vector<16x32xf32>
    %c0_1 = arith.constant 0 : index
    %c0_2 = arith.constant 0 : index
    %1 = vector.load %arg2[%c0_1, %c0_2] : memref<32x32xf32, #tpu.memory_space<vmem>>, vector<32x32xf32>
    %cst = arith.constant dense<0.000000e+00> : vector<16x32xf32>
    %2 = tpu.matmul %0, %1, %cst {dimension_numbers = #tpu.dot_dimension_numbers<[1], [0], [0], [1], [0, 0, 1, 1], [], []>} : vector<16x32xf32>, vector<32x32xf32>, vector<16x32xf32> -> vector<16x32xf32>
    %c0_3 = arith.constant 0 : index
    %c0_4 = arith.constant 0 : index
    %3 = vector.load %arg3[%c0_3, %c0_4] : memref<1x32xf32, #tpu.memory_space<vmem>>, vector<1x32xf32>
    %4 = vector.broadcast %3 : vector<1x32xf32> to vector<16x32xf32>
    %5 = arith.addf %2, %4 : vector<16x32xf32>
    %c0_5 = arith.constant 0 : index
    %c0_6 = arith.constant 0 : index
    %6 = vector.load %arg4[%c0_5, %c0_6] : memref<16x32xf32, #tpu.memory_space<vmem>>, vector<16x32xf32>
    tpu.vector_store %arg4[%c0_5, %c0_6], %5 {strides = array<i32>} : memref<16x32xf32, #tpu.memory_space<vmem>>, vector<16x32xf32>,
    return
  }
  func.func @transform_0(%arg0: i32) -> (i32, i32) {
    %c0_i32 = arith.constant 0 : i32
    %c0_i32_0 = arith.constant 0 : i32
    return %arg0, %c0_i32 : i32, i32
  }
  func.func @transform_1(%arg0: i32) -> (i32, i32) {
    %c0_i32 = arith.constant 0 : i32
    %c0_i32_0 = arith.constant 0 : i32
    %c0_i32_1 = arith.constant 0 : i32
    return %c0_i32, %c0_i32_0 : i32, i32
  }
  func.func @transform_2(%arg0: i32) -> (i32, i32) {
    %c0_i32 = arith.constant 0 : i32
    %c0_i32_0 = arith.constant 0 : i32
    %c0_i32_1 = arith.constant 0 : i32
    return %c0_i32, %c0_i32_0 : i32, i32
  }
  func.func @transform_3(%arg0: i32) -> (i32, i32) {
    %c0_i32 = arith.constant 0 : i32
    %c0_i32_0 = arith.constant 0 : i32
    return %arg0, %c0_i32 : i32, i32
  }
}

</mosaic_0001>

<bundles_post_ra>
// kernel: tpu_custom_call.1
= control target key start
LH: loop header
LB: loop body
LE: loop exit
PB: predicated region body
PF: predicated region fallthrough
CT: control target
= control target key end

     0   :  { %8 = vsyncpa [#allocation3], 0  ;;  %s340_s0 = inlined_call_operand.hbm [shape: f32[16,32], index: 0, kind: input, shape index: {}]   ;;  %s341_s1 = inlined_call_operand.hbm [shape: f32[32,32], index: 1, kind: input, shape index: {}]   ;;  %s342_s2 = inlined_call_operand.vmem [shape: f32[1,32], index: 2, kind: input, shape index: {}]   ;;  %s343_s3 = inlined_call_operand.hbm [shape: f32[16,32], index: 3, kind: output, shape index: {}]  }
   0x1   :  { %9 = vsyncpa [#allocation6], 0 }
   0x2   :  { %10 = vsyncpa [#allocation4], 0  ;;  %s263_s12 = smov [#allocation2]   ;;  %s191_s16 = scalar_lea.hbm %s340_s0, 256 }
   0x3   :  { %s16_s13 = sshll.u32 %s263_s12, 4  ;;  %p192_p0 = scmp.ne.s32.totalorder %s340_s0, %s191_s16  ;;  %s17_s13 = int_to_ptr.vmem [resolvable:$true] %s16_s13 }
   0x4   :  { %p195_p1 = scmp.lt.u32.totalorder %s191_s16, %s340_s0 }
   0x6   :  { %p197_p2 = pnand %p195_p1, %p192_p0 }
   0x8   :  { %200 = shalt.err (!%p197_p2)
}
   0x9   :  { %s201_s21 = scalar_lea.vmem %s17_s13, 256  ;;  %p206_p4 = scmp.lt.s32.totalorder %s17_s13, %s17_s13 }
   0xa   :  { %p202_p3 = scmp.ne.s32.totalorder %s17_s13, %s201_s21  ;;  %p207_p5 = scmp.lt.s32.totalorder %s201_s21, %s201_s21 }
   0xc   :  { %p208_p6 = por %p207_p5, %p206_p4 }
   0xe   :  { %p209_p7 = pnand %p208_p6, %p202_p3 }
  0x10   :  { %212 = shalt.err (!%p209_p7)
}
  0x11   :  { %s264_s22 = smov 128   ;;  %s265_s23 = smov 8  }
  0x12   :  { %22 = dma.hbm_to_vmem [thread:$0]  %s340_s0, 256, %s17_s13, [#allocation3], %s264_s22, %s264_s22, %s265_s23  }
  0x13   :  { %s266_s26 = smov [#allocation5]   ;;  %s213_s30 = scalar_lea.hbm %s341_s1, 512 }
  0x14   :  { %s28_s27 = sshll.u32 %s266_s26, 4  ;;  %p214_p8 = scmp.ne.s32.totalorder %s341_s1, %s213_s30  ;;  %s29_s27 = int_to_ptr.vmem [resolvable:$true] %s28_s27 }
  0x15   :  { %p217_p9 = scmp.lt.u32.totalorder %s213_s30, %s341_s1 }
  0x17   :  { %p219_p10 = pnand %p217_p9, %p214_p8 }
  0x19   :  { %222 = shalt.err (!%p219_p10)
}
  0x1a   :  { %s223_s8 = scalar_lea.vmem %s29_s27, 512  ;;  %p228_p12 = scmp.lt.s32.totalorder %s29_s27, %s29_s27 }
  0x1b   :  { %p224_p11 = scmp.ne.s32.totalorder %s29_s27, %s223_s8  ;;  %p229_p13 = scmp.lt.s32.totalorder %s223_s8, %s223_s8 }
  0x1d   :  { %p230_p0 = por %p229_p13, %p228_p12 }
  0x1f   :  { %p231_p1 = pnand %p230_p0, %p224_p11 }
  0x21   :  { %234 = shalt.err (!%p231_p1)
}
  0x22   :  { %34 = dma.hbm_to_vmem [thread:$0]  %s341_s1, 512, %s29_s27, [#allocation6], %s264_s22, %s264_s22, %s265_s23  }
  0x23   :  { %257 = dma.done.wait [#allocation3], 256  }
  0x24   :  { %258 = vsyncadd [#allocation3], 4294967040 }
  0x25   :  { %259 = dma.done.wait [#allocation6], 512  }
  0x26   :  { %260 = vsyncadd [#allocation6], 4294966784  ;;  %vm56_vm0 = vcmask 261120   ;;  %v45_v0 = vld [vmem:[#allocation5] sm:$0xff]  ;;  %v46_v1 = vld [vmem:[#allocation5 + $0x8] sm:$0xff]  ;;  %s267_s11 = smov [#allocation7]  }
  0x27   :  { %v47_v2 = vld [vmem:[#allocation5 + $0x10] sm:$0xff]  ;;  %v178_v3 = vpack.c.bf16 %v46_v1, %v45_v0  ;;  %v48_v4 = vld [vmem:[#allocation5 + $0x18] sm:$0xff]  ;;  %s145_s12 = sshll.u32 %s267_s11, 4  ;;  %s146_s12 = int_to_ptr.vmem [resolvable:$true] %s145_s12 }
  0x28   :  { %v43_v5 = vld [vmem:[#allocation2] sm:$0xff]  ;;  %v182_v6 = vpack.c.bf16 %v48_v4, %v47_v2  ;;  %v44_v7 = vld [vmem:[#allocation2 + $0x8] sm:$0xff]  ;;  %s235_s13 = scalar_lea.vmem %s146_s12, 256  ;;  %p240_p3 = scmp.lt.s32.totalorder %s146_s12, %s146_s12 }
  0x29   :  { %175 = vmatprep.mubr.msk.f32.mxu0 %vm56_vm0, %v43_v5  ;;  %179 = vmatprep.subr.bf16.mxu0 %v178_v3  ;;  %v158_v8 = vld [vmem:[%s342_s2] ss:$0 sm:$0xff]  ;;  %p236_p2 = scmp.ne.s32.totalorder %s146_s12, %s235_s13  ;;  %p241_p4 = scmp.lt.s32.totalorder %s235_s13, %s235_s13 }
  0x2a   :  { %181 = vmatpush3.bf16.msra.mxu0 %v178_v3 }
  0x2b   :  { %183 = vmatprep.subr.bf16.mxu0 %v182_v6  ;;  %p242_p5 = por %p241_p4, %p240_p3 }
  0x2d   :  { %p243_p6 = pnand %p242_p5, %p236_p2 }
  0x2e   :  { %185 = vmatpush3.bf16.msra.mxu0 %v182_v6 }
  0x31   :  { %176 = vmatmul.mubr.msk.f32.vlgmr.msra.gmra.mrb[0].mxu0 %vm56_vm0, %v44_v7 }
 0x104   :  { %v177_v9 = vpop.f32.mrb[0].mxu0 }
 0x105   :  { %v135_v10 = vadd.f32 %v177_v9, %v158_v8  ;;  %v129_v11 = vpop.f32.mrb[1].mxu0 }
 0x106   :  { %v130_v12 = vadd.f32 %v158_v8, %v129_v11 }
 0x107   :  { %139 = vst.msk [vmem:[#allocation7 + $0x8] sm:$0xff] %vm56_vm0, %v135_v10 }
 0x108   :  { %138 = vst.msk [vmem:[#allocation7] sm:$0xff] %vm56_vm0, %v130_v12 }
 0x109   :  { %246 = shalt.err (!%p243_p6)
}
 0x10a   :  { %s247_s15 = scalar_lea.hbm %s343_s3, 256 }
 0x10b   :  { %p248_p7 = scmp.ne.s32.totalorder %s343_s3, %s247_s15  ;;  %p251_p8 = scmp.lt.u32.totalorder %s247_s15, %s343_s3 }
 0x10d   :  { %p253_p9 = pnand %p251_p8, %p248_p7 }
 0x10f   :  { %256 = shalt.err (!%p253_p9)
}
 0x110   :  { %151 = dma.vmem_to_hbm [thread:$0]  %s146_s12, 256, %s343_s3, [#allocation4], %s264_s22, %s264_s22, %s265_s23  }
 0x111   :  { %261 = dma.done.wait [#allocation4], 256  }
 0x112   :  { %262 = vsyncadd [#allocation4], 4294967040 }
 0x113   :  { %155 = vsyncpa [#allocation3], 1 }
 0x114   :  { %156 = vsyncpa [#allocation6], 1 }
 0x115   :  { %157 = vsyncpa [#allocation4], 1 }

</bundles_post_ra>
